<compile_context>
chip_gen: v7x
topology: tpu7x:2x2x1
jax: 0.10.0
libtpu: 0.0.40
codegen_flags: <defaults>
</compile_context>

<pallas_src>
import jax
import jax.numpy as jnp
from jax.experimental import pallas as pl
from jax.experimental.pallas import tpu as pltpu


# ----------------------------------------------------------------------------
# Kernels
# ----------------------------------------------------------------------------
def conv1_proj_kernel(a_ref, x_ref, w1_ref, b1_ref, w2_ref, hw2_ref):
    """Stage 1 (per row tile of A):
         H1  = relu((A_tile @ X) @ W1 + b1)          # conv1
         HW2 = H1 @ W2                               # conv2 feature projection
       a_ref : [TM, N]   bf16 (row tile of normalized adjacency)
       x_ref : [N, 64]   bf16 (resident)
       w1    : [64, 128] bf16, b1: [1, 128] f32
       w2    : [128, 64] bf16
       hw2   : [TM, 64]  bf16 output
    """
    # NxN aggregation with the narrow (64-lane) RHS.
    ax = jnp.dot(a_ref[...], x_ref[...], preferred_element_type=jnp.float32)
    h1 = jnp.dot(ax.astype(jnp.bfloat16), w1_ref[...],
                 preferred_element_type=jnp.float32)
    h1 = jnp.maximum(h1 + b1_ref[...], 0.0)
    hw2 = jnp.dot(h1.astype(jnp.bfloat16), w2_ref[...],
                  preferred_element_type=jnp.float32)
    hw2_ref[...] = hw2.astype(hw2_ref.dtype)


def conv2_fc_kernel(a_ref, hw2_ref, b2_ref, wfc_ref, bfc_ref, out_ref):
    """Stage 2 (per row tile of A):
         H2  = relu(A_tile @ HW2 + b2)               # conv2 aggregation
         out = sum(H2 * wfc_row, -1) + bfc           # fc on the VPU/XLU
       a_ref  : [TM, N]  bf16
       hw2    : [N, 64]  bf16 (resident, from stage 1)
       b2     : [1, 64]  f32
       wfc    : [1, 64]  f32 (fc weight as a lane-broadcast row)
       bfc    : [1, 1]   f32
       out    : [TM, 1]  f32
    """
    agg = jnp.dot(a_ref[...], hw2_ref[...], preferred_element_type=jnp.float32)
    h2 = jnp.maximum(agg + b2_ref[...], 0.0)
    # 1-wide output: do it with elementwise mul + lane reduction, not the MXU.
    out_ref[...] = (jnp.sum(h2 * wfc_ref[...], axis=-1, keepdims=True)
                    + bfc_ref[...])


# ----------------------------------------------------------------------------
# Graph preprocessing (plain JAX; matches PyG gcn_norm semantics)
# ----------------------------------------------------------------------------
def build_normalized_adjacency(edge_index, num_nodes):
    """Dense D^-1/2 (A + I) D^-1/2 with PyG GCNConv semantics:
       - duplicate edges are scatter-ADDED (each contributes weight 1),
       - every node ends up with exactly one weight-1 self-loop
         (add_remaining_self_loops behavior)."""
    src = edge_index[0]
    dst = edge_index[1]
    adj = jnp.zeros((num_nodes, num_nodes), jnp.float32)
    # A[i, j] += 1 for each edge j -> i (message from src j aggregated at dst i).
    adj = adj.at[dst, src].add(1.0)
    # Exactly one weight-1 self-loop per node (replaces any explicit self-loops).
    idx = jnp.arange(num_nodes)
    adj = adj.at[idx, idx].set(1.0)
    deg = jnp.sum(adj, axis=1)
    d_inv_sqrt = jnp.where(deg > 0, 1.0 / jnp.sqrt(deg), 0.0)
    return d_inv_sqrt[:, None] * adj * d_inv_sqrt[None, :]


# ----------------------------------------------------------------------------
# Wrapper
# ----------------------------------------------------------------------------
def gcn_forward(a_norm, emb, w1, b1, w2, b2, wfc, bfc, *, tm=256):
    n, emb_dim = emb.shape
    h1_dim = w1.shape[1]
    h2_dim = w2.shape[1]

    # Row-tile size for streaming A.  TM=256 keeps 2 (double buffer) x TM x N
    # bf16 plus resident X/HW2/weights well inside v7x's 64 MiB VMEM for graphs
    # up to several thousand nodes; on v6e/v5e (128 MiB) this is conservative.
    tm = min(tm, n)
    if n % tm != 0:
        tm = n  # small-N fallback: single tile
    grid = (n // tm,)

    a_bf = a_norm.astype(jnp.bfloat16)
    x_bf = emb.astype(jnp.bfloat16)
    w1_bf = w1.astype(jnp.bfloat16)
    w2_bf = w2.astype(jnp.bfloat16)
    wfc_row = wfc.T.astype(jnp.float32)          # [1, h2_dim]

    cparams = pltpu.CompilerParams(
        dimension_semantics=("parallel",),       # shard row tiles across TCs (v7x)
        vmem_limit_bytes=32 * 1024 * 1024,       # explicit, safe on all gens
    )

    def row_tile(shape):
        return pl.BlockSpec(shape, lambda i: (i, 0))

    def resident(shape):
        return pl.BlockSpec(shape, lambda i: (0, 0))

    # ---- stage 1: HW2 = (relu((A @ X) @ W1 + b1)) @ W2 ----
    hw2 = pl.pallas_call(
        conv1_proj_kernel,
        out_shape=jax.ShapeDtypeStruct((n, h2_dim), jnp.bfloat16),
        grid=grid,
        in_specs=[
            row_tile((tm, n)),                   # A row tile (streamed)
            resident((n, emb_dim)),              # X
            resident((emb_dim, h1_dim)),         # W1
            resident((1, h1_dim)),               # b1
            resident((h1_dim, h2_dim)),          # W2
        ],
        out_specs=row_tile((tm, h2_dim)),
        compiler_params=cparams,
    )(a_bf, x_bf, w1_bf, b1, w2_bf)

    # ---- stage 2: out = relu(A @ HW2 + b2) @ Wfc + bfc ----
    out = pl.pallas_call(
        conv2_fc_kernel,
        out_shape=jax.ShapeDtypeStruct((n, 1), jnp.float32),
        grid=grid,
        in_specs=[
            row_tile((tm, n)),                   # A row tile (streamed)
            resident((n, h2_dim)),               # HW2
            resident((1, h2_dim)),               # b2
            resident((1, h2_dim)),               # wfc row
            resident((1, 1)),                    # bfc
        ],
        out_specs=row_tile((tm, 1)),
        compiler_params=cparams,
    )(a_bf, hw2, b2, wfc_row, bfc)

    # TODO(synk): for many graphs, batch them (block-diagonal A / extra grid
    #             axis) so the MXU M dimension is >= 256 per step.
    # TODO(synk): for N beyond a few thousand nodes, replace the dense A stream
    #             with a CSR/scalar-prefetch gather of neighbor rows.
    return out


# ----------------------------------------------------------------------------
# Demo / self-check
# ----------------------------------------------------------------------------
if __name__ == "__main__":
    num_nodes = 64
    embedding_dim = 64
    hidden1 = 128
    hidden2 = 64

    key = jax.random.PRNGKey(0)
    k_emb, k_edges, k_w1, k_w2, k_wfc = jax.random.split(key, 5)

    # ---- deterministic synthetic graph (edge_index: [2, E]) ----
    num_edges = 256
    edge_index = jax.random.randint(k_edges, (2, num_edges), 0, num_nodes,
                                    dtype=jnp.int32)
    a_norm = build_normalized_adjacency(edge_index, num_nodes)

    # ---- deterministic parameters (shapes from the module __init__) ----
    # embedding(torch.arange(num_nodes)) is just the full embedding table.
    emb = jax.random.normal(k_emb, (num_nodes, embedding_dim), jnp.float32)

    w1 = jax.random.normal(k_w1, (embedding_dim, hidden1), jnp.float32) * 0.1
    b1 = jnp.zeros((1, hidden1), jnp.float32)
    w2 = jax.random.normal(k_w2, (hidden1, hidden2), jnp.float32) * 0.1
    b2 = jnp.zeros((1, hidden2), jnp.float32)
    wfc = jax.random.normal(k_wfc, (hidden2, 1), jnp.float32) * 0.1
    bfc = jnp.zeros((1, 1), jnp.float32)

    out = gcn_forward(a_norm, emb, w1, b1, w2, b2, wfc, bfc)
    out = jax.block_until_ready(out)

    # pure-JAX f32 reference (bf16 MXU inputs -> ~1e-2-level relative error)
    h1 = jax.nn.relu(a_norm @ (emb @ w1) + b1)
    h2 = jax.nn.relu(a_norm @ (h1 @ w2) + b2)
    ref = h2 @ wfc + bfc
    assert out.shape == (num_nodes, 1)
    assert jnp.allclose(out, ref, atol=5e-2, rtol=5e-2)

    print("KERNEL_OK")
</pallas_src>

<mosaic_0001>
module attributes {stable_mosaic.version = 11 : i64} {
  func.func @conv1_proj_kernel(%arg0: i32, %arg1: memref<64x64xbf16, #tpu.memory_space<vmem>>, %arg2: memref<64x64xbf16, #tpu.memory_space<vmem>>, %arg3: memref<64x128xbf16, #tpu.memory_space<vmem>>, %arg4: memref<1x128xf32, #tpu.memory_space<vmem>>, %arg5: memref<128x64xbf16, #tpu.memory_space<vmem>>, %arg6: memref<64x64xbf16, #tpu.memory_space<vmem>>) attributes {dimension_semantics = [#tpu.dimension_semantics<parallel>], iteration_bounds = array<i64: 1>, scalar_prefetch = 0 : i64, scratch_operands = 0 : i64, tpu.core_type = #tpu.core_type<tc>, window_params = [{transform_indices = @transform_0, window_bounds = array<i64: 64, 64>}, {pipeline_mode = #tpu.pipeline_mode<synchronous>, transform_indices = @transform_1, window_bounds = array<i64: 64, 64>}, {pipeline_mode = #tpu.pipeline_mode<synchronous>, transform_indices = @transform_2, window_bounds = array<i64: 64, 128>}, {pipeline_mode = #tpu.pipeline_mode<synchronous>, transform_indices = @transform_3, window_bounds = array<i64: 1, 128>}, {pipeline_mode = #tpu.pipeline_mode<synchronous>, transform_indices = @transform_4, window_bounds = array<i64: 128, 64>}, {transform_indices = @transform_5, window_bounds = array<i64: 64, 64>}]} {
    %c0 = arith.constant 0 : index
    %c0_0 = arith.constant 0 : index
    %0 = vector.load %arg1[%c0, %c0_0] : memref<64x64xbf16, #tpu.memory_space<vmem>>, vector<64x64xbf16>
    %c0_1 = arith.constant 0 : index
    %c0_2 = arith.constant 0 : index
    %1 = vector.load %arg2[%c0_1, %c0_2] : memref<64x64xbf16, #tpu.memory_space<vmem>>, vector<64x64xbf16>
    %cst = arith.constant dense<0.000000e+00> : vector<64x64xf32>
    %2 = tpu.matmul %0, %1, %cst {dimension_numbers = #tpu.dot_dimension_numbers<[1], [0], [0], [1], [0, 0, 1, 1], [], []>} : vector<64x64xbf16>, vector<64x64xbf16>, vector<64x64xf32> -> vector<64x64xf32>
    %3 = arith.truncf %2 : vector<64x64xf32> to vector<64x64xbf16>
    %c0_3 = arith.constant 0 : index
    %c0_4 = arith.constant 0 : index
    %4 = vector.load %arg3[%c0_3, %c0_4] : memref<64x128xbf16, #tpu.memory_space<vmem>>, vector<64x128xbf16>
    %cst_5 = arith.constant dense<0.000000e+00> : vector<64x128xf32>
    %5 = tpu.matmul %3, %4, %cst_5 {dimension_numbers = #tpu.dot_dimension_numbers<[1], [0], [0], [1], [0, 0, 1, 1], [], []>} : vector<64x64xbf16>, vector<64x128xbf16>, vector<64x128xf32> -> vector<64x128xf32>
    %c0_6 = arith.constant 0 : index
    %c0_7 = arith.constant 0 : index
    %6 = vector.load %arg4[%c0_6, %c0_7] : memref<1x128xf32, #tpu.memory_space<vmem>>, vector<1x128xf32>
    %7 = vector.broadcast %6 : vector<1x128xf32> to vector<64x128xf32>
    %8 = arith.addf %5, %7 : vector<64x128xf32>
    %cst_8 = arith.constant 0.000000e+00 : f32
    %9 = vector.broadcast %cst_8 : f32 to vector<64x128xf32>
    %10 = arith.maximumf %8, %9 : vector<64x128xf32>
    %11 = arith.truncf %10 : vector<64x128xf32> to vector<64x128xbf16>
    %c0_9 = arith.constant 0 : index
    %c0_10 = arith.constant 0 : index
    %12 = vector.load %arg5[%c0_9, %c0_10] : memref<128x64xbf16, #tpu.memory_space<vmem>>, vector<128x64xbf16>
    %cst_11 = arith.constant dense<0.000000e+00> : vector<64x64xf32>
    %13 = tpu.matmul %11, %12, %cst_11 {dimension_numbers = #tpu.dot_dimension_numbers<[1], [0], [0], [1], [0, 0, 1, 1], [], []>} : vector<64x128xbf16>, vector<128x64xbf16>, vector<64x64xf32> -> vector<64x64xf32>
    %14 = arith.truncf %13 : vector<64x64xf32> to vector<64x64xbf16>
    %c0_12 = arith.constant 0 : index
    %c0_13 = arith.constant 0 : index
    %15 = vector.load %arg6[%c0_12, %c0_13] : memref<64x64xbf16, #tpu.memory_space<vmem>>, vector<64x64xbf16>
    tpu.vector_store %arg6[%c0_12, %c0_13], %14 {strides = array<i32>} : memref<64x64xbf16, #tpu.memory_space<vmem>>, vector<64x64xbf16>,
    return
  }
  func.func @transform_0(%arg0: i32) -> (i32, i32) {
    %c0_i32 = arith.constant 0 : i32
    %c0_i32_0 = arith.constant 0 : i32
    return %arg0, %c0_i32 : i32, i32
  }
  func.func @transform_1(%arg0: i32) -> (i32, i32) {
    %c0_i32 = arith.constant 0 : i32
    %c0_i32_0 = arith.constant 0 : i32
    %c0_i32_1 = arith.constant 0 : i32
    return %c0_i32, %c0_i32_0 : i32, i32
  }
  func.func @transform_2(%arg0: i32) -> (i32, i32) {
    %c0_i32 = arith.constant 0 : i32
    %c0_i32_0 = arith.constant 0 : i32
    %c0_i32_1 = arith.constant 0 : i32
    return %c0_i32, %c0_i32_0 : i32, i32
  }
  func.func @transform_3(%arg0: i32) -> (i32, i32) {
    %c0_i32 = arith.constant 0 : i32
    %c0_i32_0 = arith.constant 0 : i32
    %c0_i32_1 = arith.constant 0 : i32
    return %c0_i32, %c0_i32_0 : i32, i32
  }
  func.func @transform_4(%arg0: i32) -> (i32, i32) {
    %c0_i32 = arith.constant 0 : i32
    %c0_i32_0 = arith.constant 0 : i32
    %c0_i32_1 = arith.constant 0 : i32
    return %c0_i32, %c0_i32_0 : i32, i32
  }
  func.func @transform_5(%arg0: i32) -> (i32, i32) {
    %c0_i32 = arith.constant 0 : i32
    %c0_i32_0 = arith.constant 0 : i32
    return %arg0, %c0_i32 : i32, i32
  }
}

</mosaic_0001>

<bundles_post_ra>
// kernel: tpu_custom_call.1
= control target key start
LH: loop header
LB: loop body
LE: loop exit
PB: predicated region body
PF: predicated region fallthrough
CT: control target
= control target key end

     0   :  { %vm82_vm0 = vcmask 523264   ;;  %s778_s0 = inlined_call_operand.vmem [shape: bf16[64,64], index: 0, kind: input, shape index: {}]   ;;  %s779_s1 = inlined_call_operand.vmem [shape: bf16[64,64], index: 1, kind: input, shape index: {}]   ;;  %s780_s2 = inlined_call_operand.vmem [shape: bf16[64,128], index: 2, kind: input, shape index: {}]   ;;  %s781_s3 = inlined_call_operand.vmem [shape: f32[1,128], index: 3, kind: input, shape index: {}]   ;;  %s782_s4 = inlined_call_operand.vmem [shape: bf16[128,64], index: 4, kind: input, shape index: {}]   ;;  %s783_s5 = inlined_call_operand.hbm [shape: bf16[64,64], index: 5, kind: output, shape index: {}]  }
   0x1   :  { %v610_v0 = vld [vmem:[%s779_s1] sm:$0xff]   ;;  %v611_v1 = vld [vmem:[%s779_s1 + $0x8] sm:$0xff]   ;;  %v612_v2 = vld [vmem:[%s779_s1 + $0x10] sm:$0xff]  }
   0x2   :  { %551 = vmatprep.subr.bf16.mxu1 %v610_v0  ;;  %v614_v3 = vld [vmem:[%s778_s0] sm:$0xff]   ;;  %v613_v4 = vld [vmem:[%s779_s1 + $0x18] sm:$0xff]   ;;  %v615_v6 = vld [vmem:[%s778_s0 + $0x8] sm:$0xff]  }
   0x3   :  { %552 = vmatpush3.bf16.msra.mxu1 %v610_v0  ;;  %559 = vmatprep.mubr.msk.bf16.mxu1 %vm82_vm0, %v614_v3  ;;  %v618_v5 = vld [vmem:[%s780_s2] sm:$0xff]   ;;  %v616_v7 = vld [vmem:[%s778_s0 + $0x10] sm:$0xff]   ;;  %v619_v8 = vld [vmem:[%s780_s2 + $0x8] sm:$0xff]  }
   0x4   :  { %553 = vmatprep.subr.bf16.mxu1 %v611_v1 }
   0x7   :  { %554 = vmatpush3.bf16.msra.mxu1 %v611_v1 }
   0x8   :  { %555 = vmatprep.subr.bf16.mxu1 %v612_v2 }
   0xb   :  { %556 = vmatpush3.bf16.msra.mxu1 %v612_v2 }
   0xc   :  { %557 = vmatprep.subr.bf16.mxu1 %v613_v4 }
   0xf   :  { %558 = vmatpush3.bf16.msra.mxu1 %v613_v4 }
  0x10   :  { %567 = vmatprep.subr.bf16.mxu1 %v618_v5 }
  0x11   :  { %10 = vsyncpa [#allocation3], 0  ;;  %v620_v9 = vld [vmem:[%s780_s2 + $0x10] sm:$0xff]   ;;  %v617_v10 = vld [vmem:[%s778_s0 + $0x18] sm:$0xff]   ;;  %vm453_vm1 = vcmask 519168  }
  0x12   :  { %560 = vmatmul.mubr.msk.bf16.vlgmr.msra.gmra.mrb[0].mxu1 %vm82_vm0, %v615_v6  ;;  %v621_v11 = vld [vmem:[%s780_s2 + $0x18] sm:$0xff]   ;;  %v622_v12 = vld [vmem:[%s782_s4] sm:$0xff]   ;;  %v623_v13 = vld [vmem:[%s782_s4 + $0x8] sm:$0xff]  }
  0x13   :  { %563 = vmatprep.mubr.msk.bf16.mxu1 %vm82_vm0, %v616_v7  ;;  %568 = vmatpush3.bf16.msra.mxu1 %v618_v5  ;;  %v624_v14 = vld [vmem:[%s782_s4 + $0x10] sm:$0xff]   ;;  %v625_v15 = vld [vmem:[%s782_s4 + $0x18] sm:$0xff]   ;;  %v626_v16 = vld [vmem:[%s782_s4 + $0x20] sm:$0xff]  }
  0x14   :  { %569 = vmatprep.subr.bf16.mxu1 %v619_v8  ;;  %583 = vmatprep.subr.bf16.mxu0 %v622_v12  ;;  %v627_v17 = vld [vmem:[%s782_s4 + $0x28] sm:$0xff]   ;;  %v628_v30 = vld [vmem:[%s782_s4 + $0x30] sm:$0xff]   ;;  %v629_v31 = vld [vmem:[%s782_s4 + $0x38] sm:$0xff]  }
  0x15   :  { %584 = vmatpush3.bf16.msra.mxu0 %v622_v12  ;;  %v490_v32 = vld [vmem:[%s781_s3] ss:$0 sm:$0xff]  ;;  %s654_s3 = smov [#allocation2]  }
  0x16   :  { %585 = vmatprep.subr.bf16.mxu0 %v623_v13  ;;  %s467_s4 = sshll.u32 %s654_s3, 4  ;;  %s468_s4 = int_to_ptr.vmem [resolvable:$true] %s467_s4 }
  0x17   :  { %570 = vmatpush3.bf16.msra.mxu1 %v619_v8  ;;  %s630_s7 = scalar_lea.vmem %s468_s4, 512  ;;  %p635_p1 = scmp.lt.s32.totalorder %s468_s4, %s468_s4 }
  0x18   :  { %571 = vmatprep.subr.bf16.mxu1 %v620_v9  ;;  %p631_p0 = scmp.ne.s32.totalorder %s468_s4, %s630_s7  ;;  %p636_p2 = scmp.lt.s32.totalorder %s630_s7, %s630_s7 }
  0x19   :  { %586 = vmatpush3.bf16.msra.mxu0 %v623_v13 }
  0x1a   :  { %564 = vmatmul.mubr.msk.bf16.gmra.mrb[4].mxu1 %vm82_vm0, %v617_v10  ;;  %587 = vmatprep.subr.bf16.mxu0 %v624_v14  ;;  %p637_p3 = por %p636_p2, %p635_p1 }
  0x1b   :  { %572 = vmatpush3.bf16.msra.mxu1 %v620_v9 }
  0x1c   :  { %573 = vmatprep.subr.bf16.mxu1 %v621_v11  ;;  %p638_p4 = pnand %p637_p3, %p631_p0 }
  0x1d   :  { %588 = vmatpush3.bf16.msra.mxu0 %v624_v14 }
  0x1e   :  { %589 = vmatprep.subr.bf16.mxu0 %v625_v15 }
  0x1f   :  { %574 = vmatpush3.bf16.msra.mxu1 %v621_v11 }
  0x21   :  { %590 = vmatpush3.bf16.msra.mxu0 %v625_v15 }
  0x22   :  { %591 = vmatprep.subr.bf16.mxu0 %v626_v16 }
  0x25   :  { %592 = vmatpush3.bf16.msra.mxu0 %v626_v16 }
  0x26   :  { %593 = vmatprep.subr.bf16.mxu0 %v627_v17 }
  0x29   :  { %594 = vmatpush3.bf16.msra.mxu0 %v627_v17 }
  0x2a   :  { %595 = vmatprep.subr.bf16.mxu0 %v628_v30 }
  0x2d   :  { %596 = vmatpush3.bf16.msra.mxu0 %v628_v30 }
  0x2e   :  { %597 = vmatprep.subr.bf16.mxu0 %v629_v31 }
  0x31   :  { %598 = vmatpush3.bf16.msra.mxu0 %v629_v31 }
  0xe5   :  { %v561_v18 = vpop.f32.mrb[0].mxu1 }
  0xe6   :  { %v129_v19 = vpop.f32.mrb[1].mxu1 }
  0xe7   :  { %v562_v20 = vpop.f32.mrb[2].mxu1 }
  0xe8   :  { %v161_v21 = vpack.c.bf16 %v562_v20, %v561_v18  ;;  %v132_v22 = vpop.f32.mrb[3].mxu1 }
  0xe9   :  { %v160_v23 = vpack.c.bf16 %v132_v22, %v129_v19 }
  0xeb   :  { %575 = vmatprep.mubr.msk.bf16.mxu1 %vm82_vm0, %v160_v23 }
  0xec   :  { %576 = vmatmul.mubr.msk.bf16.vlgmr.msra.gmra.mrb[8].mxu1 %vm82_vm0, %v161_v21 }
  0xed   :  { %v565_v24 = vpop.f32.mrb[4].mxu1 }
  0xee   :  { %v145_v25 = vpop.f32.mrb[5].mxu1 }
  0xef   :  { %v566_v26 = vpop.f32.mrb[6].mxu1 }
  0xf0   :  { %v163_v27 = vpack.c.bf16 %v566_v26, %v565_v24  ;;  %v148_v28 = vpop.f32.mrb[7].mxu1 }
  0xf1   :  { %v162_v29 = vpack.c.bf16 %v148_v28, %v145_v25 }
  0xf3   :  { %579 = vmatprep.mubr.msk.bf16.mxu1 %vm82_vm0, %v162_v29 }
  0xf4   :  { %580 = vmatmul.mubr.msk.bf16.gmra.mrb[12].mxu1 %vm82_vm0, %v163_v27 }
 0x1bf   :  { %v577_v33 = vpop.f32.mrb[8].mxu1 }
 0x1c0   :  { %v258_v34 = vadd.f32 %v577_v33, %v490_v32  ;;  %v249_v35 = vpop.f32.mrb[9].mxu1 }
 0x1c1   :  { %v250_v36 = vadd.f32 %v490_v32, %v249_v35  ;;  %v578_v37 = vpop.f32.mrb[10].mxu1 }
 0x1c2   :  { %v261_v38 = vadd.f32 %v578_v37, %v490_v32  ;;  %v252_v39 = vpop.f32.mrb[11].mxu1  ;;  %v282_v41 = vmax.f32 %v258_v34, 0.0 }
 0x1c3   :  { %v253_v40 = vadd.f32 %v490_v32, %v252_v39  ;;  %v280_v43 = vmax.f32 %v250_v36, 0.0 }
 0x1c4   :  { %v283_v42 = vmax.f32 %v261_v38, 0.0 }
 0x1c5   :  { %v281_v44 = vmax.f32 %v253_v40, 0.0 }
 0x1c6   :  { %v289_v45 = vpack.c.bf16 %v283_v42, %v282_v41 }
 0x1c7   :  { %v581_v46 = vpop.f32.mrb[12].mxu1  ;;  %v288_v47 = vpack.c.bf16 %v281_v44, %v280_v43 }
 0x1c8   :  { %v274_v48 = vadd.f32 %v581_v46, %v490_v32  ;;  %v265_v49 = vpop.f32.mrb[13].mxu1 }
 0x1c9   :  { %v266_v50 = vadd.f32 %v490_v32, %v265_v49  ;;  %v582_v51 = vpop.f32.mrb[14].mxu1  ;;  %599 = vmatprep.mubr.bf16.mxu0 %v288_v47 }
 0x1ca   :  { %v277_v52 = vadd.f32 %v582_v51, %v490_v32  ;;  %v268_v53 = vpop.f32.mrb[15].mxu1  ;;  %600 = vmatmul.mubr.bf16.vlgmr.msra.gmra.mrb[0].mxu0 %v289_v45  ;;  %v286_v55 = vmax.f32 %v274_v48, 0.0 }
 0x1cb   :  { %v269_v54 = vadd.f32 %v490_v32, %v268_v53  ;;  %v284_v57 = vmax.f32 %v266_v50, 0.0 }
 0x1cc   :  { %v287_v56 = vmax.f32 %v277_v52, 0.0 }
 0x1cd   :  { %v285_v58 = vmax.f32 %v269_v54, 0.0 }
 0x1ce   :  { %v291_v59 = vpack.c.bf16 %v287_v56, %v286_v55 }
 0x1cf   :  { %v290_v60 = vpack.c.bf16 %v285_v58, %v284_v57 }
 0x1d1   :  { %603 = vmatprep.mubr.bf16.mxu0 %v290_v60 }
 0x1d2   :  { %604 = vmatmul.mubr.bf16.gmra.mrb[4].mxu0 %v291_v59 }
 0x29d   :  { %v601_v61 = vpop.f32.mrb[0].mxu0 }
 0x29e   :  { %v517_v62 = vpack.c.bf16 %v601_v61, %v601_v61  ;;  %v390_v63 = vpop.f32.mrb[1].mxu0 }
 0x29f   :  { %v515_v0 = vpack.c.bf16 %v390_v63, %v390_v63  ;;  %v602_v1 = vpop.f32.mrb[2].mxu0 }
 0x2a0   :  { %456 = vst.msk [vmem:[#allocation2 + $0x8] sm:$0xf] %vm453_vm1, %v517_v62  ;;  %v518_v2 = vpack.c.bf16 %v602_v1, %v602_v1  ;;  %v393_v3 = vpop.f32.mrb[3].mxu0 }
 0x2a1   :  { %454 = vst.msk [vmem:[#allocation2] sm:$0xf] %vm453_vm1, %v515_v0  ;;  %v516_v4 = vpack.c.bf16 %v393_v3, %v393_v3 }
 0x2a2   :  { %457 = vst.msk [vmem:[#allocation2 + $0xc] sm:$0xf] %vm453_vm1, %v518_v2 }
 0x2a3   :  { %455 = vst.msk [vmem:[#allocation2 + $0x4] sm:$0xf] %vm453_vm1, %v516_v4 }
 0x2a5   :  { %v605_v5 = vpop.f32.mrb[4].mxu0 }
 0x2a6   :  { %v521_v6 = vpack.c.bf16 %v605_v5, %v605_v5  ;;  %v406_v7 = vpop.f32.mrb[5].mxu0 }
 0x2a7   :  { %v519_v8 = vpack.c.bf16 %v406_v7, %v406_v7  ;;  %v606_v9 = vpop.f32.mrb[6].mxu0 }
 0x2a8   :  { %460 = vst.msk [vmem:[#allocation2 + $0x18] sm:$0xf] %vm453_vm1, %v521_v6  ;;  %v522_v10 = vpack.c.bf16 %v606_v9, %v606_v9  ;;  %v409_v11 = vpop.f32.mrb[7].mxu0 }
 0x2a9   :  { %458 = vst.msk [vmem:[#allocation2 + $0x10] sm:$0xf] %vm453_vm1, %v519_v8  ;;  %v520_v12 = vpack.c.bf16 %v409_v11, %v409_v11 }
 0x2aa   :  { %461 = vst.msk [vmem:[#allocation2 + $0x1c] sm:$0xf] %vm453_vm1, %v522_v10 }
 0x2ab   :  { %459 = vst.msk [vmem:[#allocation2 + $0x14] sm:$0xf] %vm453_vm1, %v520_v12 }
 0x2ac   :  { %641 = shalt.err (!%p638_p4)
}
 0x2ad   :  { %s642_s10 = scalar_lea.hbm %s783_s5, 512 }
 0x2ae   :  { %p643_p5 = scmp.ne.s32.totalorder %s783_s5, %s642_s10  ;;  %p646_p6 = scmp.lt.u32.totalorder %s642_s10, %s783_s5 }
 0x2b0   :  { %p648_p7 = pnand %p646_p6, %p643_p5 }
 0x2b2   :  { %651 = shalt.err (!%p648_p7)
}
 0x2b3   :  { %s655_s14 = smov 64   ;;  %s656_s15 = smov 4  }
 0x2b4   :  { %473 = dma.vmem_to_hbm [thread:$0]  %s468_s4, 512, %s783_s5, [#allocation3], %s655_s14, %s655_s14, %s656_s15  }
 0x2b5   :  { %652 = dma.done.wait [#allocation3], 512  }
 0x2b6   :  { %653 = vsyncadd [#allocation3], 4294966784 }
 0x2b7   :  { %477 = vsyncpa [#allocation3], 1 }

</bundles_post_ra>
